<compile_context>
chip_gen: v5e
topology: v5e:2x2
jax: 0.10.0
libtpu: 0.0.40
codegen_flags: <defaults>
</compile_context>

<pallas_src>
import numpy as np
import jax
import jax.numpy as jnp
from jax.experimental import pallas as pl
from jax.experimental.pallas import tpu as pltpu


def mv_lstm_kernel(xp_ref, w_hh_ref, w_lin_ref, b_lin_ref, out_ref, hs_ref):
    """LSTM recurrence + final Linear, with the input projection precomputed.

    Refs (all VMEM, fp32):
      xp_ref:    (T, B, 4*Hp)  precomputed x @ W_ih + (b_ih + b_hh), time-major
      w_hh_ref:  (Hp, 4*Hp)    hidden->gates weights (pre-transposed, zero-padded)
      w_lin_ref: (T*Hp, 2)     final Linear weight (flatten order t*Hp + h, padded rows = 0)
      b_lin_ref: (1, 2)        final Linear bias
      out_ref:   (B, 2)        output
      hs_ref:    (B, T*Hp)     scratch holding all hidden states for the final matmul
    """
    T, B, G = xp_ref.shape
    Hp = G // 4

    w_hh = w_hh_ref[...]                       # (Hp, 4Hp), loaded once

    h = jnp.zeros((B, Hp), jnp.float32)
    c = jnp.zeros((B, Hp), jnp.float32)

    # Fully unrolled serial recurrence (T is small & static).  Only h @ W_hh is on the
    # critical path; padded hidden lanes stay exactly zero throughout.
    for t in range(T):
        gates = xp_ref[t] + jnp.dot(h, w_hh, preferred_element_type=jnp.float32)  # (B, 4Hp)
        i_g = jax.nn.sigmoid(gates[:, 0:Hp])
        f_g = jax.nn.sigmoid(gates[:, Hp:2 * Hp])
        g_g = jnp.tanh(gates[:, 2 * Hp:3 * Hp])
        o_g = jax.nn.sigmoid(gates[:, 3 * Hp:4 * Hp])
        c = f_g * c + i_g * g_g
        h = o_g * jnp.tanh(c)
        hs_ref[:, t * Hp:(t + 1) * Hp] = h     # static lane-aligned store, off MXU path

    # Single output projection: (B, T*Hp) @ (T*Hp, 2) == flatten(lstm_out) @ W_lin^T.
    out_ref[...] = (
        jnp.dot(hs_ref[...], w_lin_ref[...], preferred_element_type=jnp.float32)
        + b_lin_ref[...]
    )


def _pad_gate_axis(w, H, Hp, axis):
    """Split a 4*H axis into (4, H), zero-pad H -> Hp, merge back to 4*Hp."""
    shape = w.shape
    w4 = w.reshape(shape[:axis] + (4, H) + shape[axis + 1:])
    pad = [(0, 0)] * w4.ndim
    pad[axis + 1] = (0, Hp - H)
    w4 = jnp.pad(w4, pad)
    return w4.reshape(shape[:axis] + (4 * Hp,) + shape[axis + 1:])


def mv_lstm_forward(x, params):
    """x: (B, T, F) float32 (PyTorch batch_first layout). Returns (B, 2)."""
    w_ih, w_hh, b_ih, b_hh, w_lin, b_lin = params
    B, T, F = x.shape
    H = w_hh.shape[1]            # torch W_hh is (4H, H)
    Hp = 32                      # pad hidden 20 -> 32 so 4*Hp = 128 lanes

    x = x.astype(jnp.float32)

    # --- weight prep (padded, gate order i,f,g,o preserved at offsets 0/Hp/2Hp/3Hp) ---
    w_ih_p = _pad_gate_axis(jnp.transpose(w_ih).astype(jnp.float32), H, Hp, axis=1)   # (F, 4Hp)
    w_hh_t = jnp.transpose(w_hh).astype(jnp.float32)                                   # (H, 4H)
    w_hh_p = _pad_gate_axis(jnp.pad(w_hh_t, ((0, Hp - H), (0, 0))), H, Hp, axis=1)     # (Hp, 4Hp)
    b_p = _pad_gate_axis((b_ih + b_hh).astype(jnp.float32), H, Hp, axis=0).reshape(1, 4 * Hp)

    # torch Linear weight is (2, T*H); flatten order of lstm_out.view(B,-1) is t*H + h.
    w_lin_p = jnp.transpose(w_lin).reshape(T, H, 2).astype(jnp.float32)
    w_lin_p = jnp.pad(w_lin_p, ((0, 0), (0, Hp - H), (0, 0))).reshape(T * Hp, 2)       # (T*Hp, 2)
    b_lin_r = b_lin.reshape(1, 2).astype(jnp.float32)

    # --- hoisted input projection: one matmul, bias folded in, produced time-major ---
    x_proj = jnp.einsum('btf,fg->tbg', x, w_ih_p) + b_p                                # (T, B, 4Hp)

    full = lambda shape: pl.BlockSpec(shape, lambda i, _n=len(shape): (0,) * _n)

    return pl.pallas_call(
        mv_lstm_kernel,
        out_shape=jax.ShapeDtypeStruct((B, 2), jnp.float32),
        grid=(1,),
        in_specs=[
            full((T, B, 4 * Hp)),
            full((Hp, 4 * Hp)),
            full((T * Hp, 2)),
            full((1, 2)),
        ],
        out_specs=full((B, 2)),
        scratch_shapes=[pltpu.VMEM((B, T * Hp), jnp.float32)],
        compiler_params=pltpu.CompilerParams(dimension_semantics=("arbitrary",)),
    )(x_proj, w_hh_p, w_lin_p, b_lin_r)


def mv_lstm_reference(x, params):
    """Pure-JAX reference of the same forward pass (for verification)."""
    w_ih, w_hh, b_ih, b_hh, w_lin, b_lin = params
    B, T, F = x.shape
    H = w_hh.shape[1]

    def step(carry, x_t):
        h, c = carry
        gates = x_t @ w_ih.T + h @ w_hh.T + b_ih + b_hh
        i_g = jax.nn.sigmoid(gates[:, 0:H])
        f_g = jax.nn.sigmoid(gates[:, H:2 * H])
        g_g = jnp.tanh(gates[:, 2 * H:3 * H])
        o_g = jax.nn.sigmoid(gates[:, 3 * H:4 * H])
        c = f_g * c + i_g * g_g
        h = o_g * jnp.tanh(c)
        return (h, c), h

    h0 = jnp.zeros((B, H), jnp.float32)
    c0 = jnp.zeros((B, H), jnp.float32)
    _, hs = jax.lax.scan(step, (h0, c0), jnp.transpose(x, (1, 0, 2)))   # (T, B, H)
    flat = jnp.transpose(hs, (1, 0, 2)).reshape(B, T * H)
    return flat @ w_lin.T + b_lin


if __name__ == "__main__":
    # Module hyperparameters (n_hidden=20 is fixed by the module).
    B, T, F, H = 2, 8, 4, 20

    key = jax.random.PRNGKey(0)
    ks = jax.random.split(key, 7)
    scale = 0.1
    w_ih = scale * jax.random.normal(ks[0], (4 * H, F), jnp.float32)
    w_hh = scale * jax.random.normal(ks[1], (4 * H, H), jnp.float32)
    b_ih = scale * jax.random.normal(ks[2], (4 * H,), jnp.float32)
    b_hh = scale * jax.random.normal(ks[3], (4 * H,), jnp.float32)
    w_lin = scale * jax.random.normal(ks[4], (2, T * H), jnp.float32)
    b_lin = scale * jax.random.normal(ks[5], (2,), jnp.float32)
    params = (w_ih, w_hh, b_ih, b_hh, w_lin, b_lin)

    x = jax.random.normal(ks[6], (B, T, F), jnp.float32)

    out = jax.block_until_ready(mv_lstm_forward(x, params))
    ref = jax.block_until_ready(mv_lstm_reference(x, params))

    assert out.shape == (B, 2)
    np.testing.assert_allclose(np.asarray(out), np.asarray(ref), rtol=1e-5, atol=1e-5)

    print("KERNEL_OK")
</pallas_src>

<mosaic_0001>
module attributes {stable_mosaic.version = 11 : i64} {
  func.func @mv_lstm_kernel(%arg0: i32, %arg1: memref<8x2x128xf32, #tpu.memory_space<vmem>>, %arg2: memref<32x128xf32, #tpu.memory_space<vmem>>, %arg3: memref<256x2xf32, #tpu.memory_space<vmem>>, %arg4: memref<1x2xf32, #tpu.memory_space<vmem>>, %arg5: memref<2x2xf32, #tpu.memory_space<vmem>>, %arg6: memref<2x256xf32, #tpu.memory_space<vmem>>) attributes {dimension_semantics = [#tpu.dimension_semantics<arbitrary>], iteration_bounds = array<i64: 1>, scalar_prefetch = 0 : i64, scratch_operands = 1 : i64, tpu.core_type = #tpu.core_type<tc>, window_params = [{pipeline_mode = #tpu.pipeline_mode<synchronous>, transform_indices = @transform_0, window_bounds = array<i64: 8, 2, 128>}, {pipeline_mode = #tpu.pipeline_mode<synchronous>, transform_indices = @transform_1, window_bounds = array<i64: 32, 128>}, {pipeline_mode = #tpu.pipeline_mode<synchronous>, transform_indices = @transform_2, window_bounds = array<i64: 256, 2>}, {pipeline_mode = #tpu.pipeline_mode<synchronous>, transform_indices = @transform_3, window_bounds = array<i64: 1, 2>}, {pipeline_mode = #tpu.pipeline_mode<synchronous>, transform_indices = @transform_4, window_bounds = array<i64: 2, 2>}]} {
    %c0 = arith.constant 0 : index
    %c0_0 = arith.constant 0 : index
    %0 = vector.load %arg2[%c0, %c0_0] : memref<32x128xf32, #tpu.memory_space<vmem>>, vector<32x128xf32>
    %cst = arith.constant 0.000000e+00 : f32
    %1 = vector.broadcast %cst : f32 to vector<2x32xf32>
    %cst_1 = arith.constant 0.000000e+00 : f32
    %2 = vector.broadcast %cst_1 : f32 to vector<2x32xf32>
    %c0_2 = arith.constant 0 : index
    %c0_3 = arith.constant 0 : index
    %c0_4 = arith.constant 0 : index
    %3 = vector.load %arg1[%c0_2, %c0_3, %c0_4] : memref<8x2x128xf32, #tpu.memory_space<vmem>>, vector<1x2x128xf32>
    %4 = vector.shape_cast %3 : vector<1x2x128xf32> to vector<2x128xf32>
    %cst_5 = arith.constant dense<0.000000e+00> : vector<2x128xf32>
    %5 = tpu.matmul %1, %0, %cst_5 {dimension_numbers = #tpu.dot_dimension_numbers<[1], [0], [0], [1], [0, 0, 1, 1], [], []>} : vector<2x32xf32>, vector<32x128xf32>, vector<2x128xf32> -> vector<2x128xf32>
    %6 = arith.addf %4, %5 : vector<2x128xf32>
    %7 = vector.extract_strided_slice %6 {offsets = [0, 0], sizes = [2, 32], strides = [1, 1]} : vector<2x128xf32> to vector<2x32xf32>
    %8 = arith.negf %7 : vector<2x32xf32>
    %9 = math.exp %8 : vector<2x32xf32>
    %cst_6 = arith.constant 1.000000e+00 : f32
    %10 = vector.broadcast %cst_6 : f32 to vector<2x32xf32>
    %11 = arith.addf %10, %9 : vector<2x32xf32>
    %12 = arith.divf %10, %11 : vector<2x32xf32>
    %13 = vector.extract_strided_slice %6 {offsets = [0, 32], sizes = [2, 32], strides = [1, 1]} : vector<2x128xf32> to vector<2x32xf32>
    %14 = arith.negf %13 : vector<2x32xf32>
    %15 = math.exp %14 : vector<2x32xf32>
    %cst_7 = arith.constant 1.000000e+00 : f32
    %16 = vector.broadcast %cst_7 : f32 to vector<2x32xf32>
    %17 = arith.addf %16, %15 : vector<2x32xf32>
    %18 = arith.divf %16, %17 : vector<2x32xf32>
    %19 = vector.extract_strided_slice %6 {offsets = [0, 64], sizes = [2, 32], strides = [1, 1]} : vector<2x128xf32> to vector<2x32xf32>
    %20 = math.tanh %19 : vector<2x32xf32>
    %21 = vector.extract_strided_slice %6 {offsets = [0, 96], sizes = [2, 32], strides = [1, 1]} : vector<2x128xf32> to vector<2x32xf32>
    %22 = arith.negf %21 : vector<2x32xf32>
    %23 = math.exp %22 : vector<2x32xf32>
    %cst_8 = arith.constant 1.000000e+00 : f32
    %24 = vector.broadcast %cst_8 : f32 to vector<2x32xf32>
    %25 = arith.addf %24, %23 : vector<2x32xf32>
    %26 = arith.divf %24, %25 : vector<2x32xf32>
    %27 = arith.mulf %18, %2 : vector<2x32xf32>
    %28 = arith.mulf %12, %20 : vector<2x32xf32>
    %29 = arith.addf %27, %28 : vector<2x32xf32>
    %30 = math.tanh %29 : vector<2x32xf32>
    %31 = arith.mulf %26, %30 : vector<2x32xf32>
    %c0_9 = arith.constant 0 : index
    %c0_10 = arith.constant 0 : index
    %32 = vector.load %arg6[%c0_9, %c0_10] : memref<2x256xf32, #tpu.memory_space<vmem>>, vector<2x32xf32>
    tpu.vector_store %arg6[%c0_9, %c0_10], %31 {strides = array<i32>} : memref<2x256xf32, #tpu.memory_space<vmem>>, vector<2x32xf32>,
    %c1 = arith.constant 1 : index
    %c0_11 = arith.constant 0 : index
    %c0_12 = arith.constant 0 : index
    %33 = vector.load %arg1[%c1, %c0_11, %c0_12] : memref<8x2x128xf32, #tpu.memory_space<vmem>>, vector<1x2x128xf32>
    %34 = vector.shape_cast %33 : vector<1x2x128xf32> to vector<2x128xf32>
    %cst_13 = arith.constant dense<0.000000e+00> : vector<2x128xf32>
    %35 = tpu.matmul %31, %0, %cst_13 {dimension_numbers = #tpu.dot_dimension_numbers<[1], [0], [0], [1], [0, 0, 1, 1], [], []>} : vector<2x32xf32>, vector<32x128xf32>, vector<2x128xf32> -> vector<2x128xf32>
    %36 = arith.addf %34, %35 : vector<2x128xf32>
    %37 = vector.extract_strided_slice %36 {offsets = [0, 0], sizes = [2, 32], strides = [1, 1]} : vector<2x128xf32> to vector<2x32xf32>
    %38 = arith.negf %37 : vector<2x32xf32>
    %39 = math.exp %38 : vector<2x32xf32>
    %cst_14 = arith.constant 1.000000e+00 : f32
    %40 = vector.broadcast %cst_14 : f32 to vector<2x32xf32>
    %41 = arith.addf %40, %39 : vector<2x32xf32>
    %42 = arith.divf %40, %41 : vector<2x32xf32>
    %43 = vector.extract_strided_slice %36 {offsets = [0, 32], sizes = [2, 32], strides = [1, 1]} : vector<2x128xf32> to vector<2x32xf32>
    %44 = arith.negf %43 : vector<2x32xf32>
    %45 = math.exp %44 : vector<2x32xf32>
    %cst_15 = arith.constant 1.000000e+00 : f32
    %46 = vector.broadcast %cst_15 : f32 to vector<2x32xf32>
    %47 = arith.addf %46, %45 : vector<2x32xf32>
    %48 = arith.divf %46, %47 : vector<2x32xf32>
    %49 = vector.extract_strided_slice %36 {offsets = [0, 64], sizes = [2, 32], strides = [1, 1]} : vector<2x128xf32> to vector<2x32xf32>
    %50 = math.tanh %49 : vector<2x32xf32>
    %51 = vector.extract_strided_slice %36 {offsets = [0, 96], sizes = [2, 32], strides = [1, 1]} : vector<2x128xf32> to vector<2x32xf32>
    %52 = arith.negf %51 : vector<2x32xf32>
    %53 = math.exp %52 : vector<2x32xf32>
    %cst_16 = arith.constant 1.000000e+00 : f32
    %54 = vector.broadcast %cst_16 : f32 to vector<2x32xf32>
    %55 = arith.addf %54, %53 : vector<2x32xf32>
    %56 = arith.divf %54, %55 : vector<2x32xf32>
    %57 = arith.mulf %48, %29 : vector<2x32xf32>
    %58 = arith.mulf %42, %50 : vector<2x32xf32>
    %59 = arith.addf %57, %58 : vector<2x32xf32>
    %60 = math.tanh %59 : vector<2x32xf32>
    %61 = arith.mulf %56, %60 : vector<2x32xf32>
    %c0_17 = arith.constant 0 : index
    %c32 = arith.constant 32 : index
    %62 = vector.load %arg6[%c0_17, %c32] : memref<2x256xf32, #tpu.memory_space<vmem>>, vector<2x32xf32>
    tpu.vector_store %arg6[%c0_17, %c32], %61 {strides = array<i32>} : memref<2x256xf32, #tpu.memory_space<vmem>>, vector<2x32xf32>,
    %c2 = arith.constant 2 : index
    %c0_18 = arith.constant 0 : index
    %c0_19 = arith.constant 0 : index
    %63 = vector.load %arg1[%c2, %c0_18, %c0_19] : memref<8x2x128xf32, #tpu.memory_space<vmem>>, vector<1x2x128xf32>
    %64 = vector.shape_cast %63 : vector<1x2x128xf32> to vector<2x128xf32>
    %cst_20 = arith.constant dense<0.000000e+00> : vector<2x128xf32>
    %65 = tpu.matmul %61, %0, %cst_20 {dimension_numbers = #tpu.dot_dimension_numbers<[1], [0], [0], [1], [0, 0, 1, 1], [], []>} : vector<2x32xf32>, vector<32x128xf32>, vector<2x128xf32> -> vector<2x128xf32>
    %66 = arith.addf %64, %65 : vector<2x128xf32>
    %67 = vector.extract_strided_slice %66 {offsets = [0, 0], sizes = [2, 32], strides = [1, 1]} : vector<2x128xf32> to vector<2x32xf32>
    %68 = arith.negf %67 : vector<2x32xf32>
    %69 = math.exp %68 : vector<2x32xf32>
    %cst_21 = arith.constant 1.000000e+00 : f32
    %70 = vector.broadcast %cst_21 : f32 to vector<2x32xf32>
    %71 = arith.addf %70, %69 : vector<2x32xf32>
    %72 = arith.divf %70, %71 : vector<2x32xf32>
    %73 = vector.extract_strided_slice %66 {offsets = [0, 32], sizes = [2, 32], strides = [1, 1]} : vector<2x128xf32> to vector<2x32xf32>
    %74 = arith.negf %73 : vector<2x32xf32>
    %75 = math.exp %74 : vector<2x32xf32>
    %cst_22 = arith.constant 1.000000e+00 : f32
    %76 = vector.broadcast %cst_22 : f32 to vector<2x32xf32>
    %77 = arith.addf %76, %75 : vector<2x32xf32>
    %78 = arith.divf %76, %77 : vector<2x32xf32>
    %79 = vector.extract_strided_slice %66 {offsets = [0, 64], sizes = [2, 32], strides = [1, 1]} : vector<2x128xf32> to vector<2x32xf32>
    %80 = math.tanh %79 : vector<2x32xf32>
    %81 = vector.extract_strided_slice %66 {offsets = [0, 96], sizes = [2, 32], strides = [1, 1]} : vector<2x128xf32> to vector<2x32xf32>
    %82 = arith.negf %81 : vector<2x32xf32>
    %83 = math.exp %82 : vector<2x32xf32>
    %cst_23 = arith.constant 1.000000e+00 : f32
    %84 = vector.broadcast %cst_23 : f32 to vector<2x32xf32>
    %85 = arith.addf %84, %83 : vector<2x32xf32>
    %86 = arith.divf %84, %85 : vector<2x32xf32>
    %87 = arith.mulf %78, %59 : vector<2x32xf32>
    %88 = arith.mulf %72, %80 : vector<2x32xf32>
    %89 = arith.addf %87, %88 : vector<2x32xf32>
    %90 = math.tanh %89 : vector<2x32xf32>
    %91 = arith.mulf %86, %90 : vector<2x32xf32>
    %c0_24 = arith.constant 0 : index
    %c64 = arith.constant 64 : index
    %92 = vector.load %arg6[%c0_24, %c64] : memref<2x256xf32, #tpu.memory_space<vmem>>, vector<2x32xf32>
    tpu.vector_store %arg6[%c0_24, %c64], %91 {strides = array<i32>} : memref<2x256xf32, #tpu.memory_space<vmem>>, vector<2x32xf32>,
    %c3 = arith.constant 3 : index
    %c0_25 = arith.constant 0 : index
    %c0_26 = arith.constant 0 : index
    %93 = vector.load %arg1[%c3, %c0_25, %c0_26] : memref<8x2x128xf32, #tpu.memory_space<vmem>>, vector<1x2x128xf32>
    %94 = vector.shape_cast %93 : vector<1x2x128xf32> to vector<2x128xf32>
    %cst_27 = arith.constant dense<0.000000e+00> : vector<2x128xf32>
    %95 = tpu.matmul %91, %0, %cst_27 {dimension_numbers = #tpu.dot_dimension_numbers<[1], [0], [0], [1], [0, 0, 1, 1], [], []>} : vector<2x32xf32>, vector<32x128xf32>, vector<2x128xf32> -> vector<2x128xf32>
    %96 = arith.addf %94, %95 : vector<2x128xf32>
    %97 = vector.extract_strided_slice %96 {offsets = [0, 0], sizes = [2, 32], strides = [1, 1]} : vector<2x128xf32> to vector<2x32xf32>
    %98 = arith.negf %97 : vector<2x32xf32>
    %99 = math.exp %98 : vector<2x32xf32>
    %cst_28 = arith.constant 1.000000e+00 : f32
    %100 = vector.broadcast %cst_28 : f32 to vector<2x32xf32>
    %101 = arith.addf %100, %99 : vector<2x32xf32>
    %102 = arith.divf %100, %101 : vector<2x32xf32>
    %103 = vector.extract_strided_slice %96 {offsets = [0, 32], sizes = [2, 32], strides = [1, 1]} : vector<2x128xf32> to vector<2x32xf32>
    %104 = arith.negf %103 : vector<2x32xf32>
    %105 = math.exp %104 : vector<2x32xf32>
    %cst_29 = arith.constant 1.000000e+00 : f32
    %106 = vector.broadcast %cst_29 : f32 to vector<2x32xf32>
    %107 = arith.addf %106, %105 : vector<2x32xf32>
    %108 = arith.divf %106, %107 : vector<2x32xf32>
    %109 = vector.extract_strided_slice %96 {offsets = [0, 64], sizes = [2, 32], strides = [1, 1]} : vector<2x128xf32> to vector<2x32xf32>
    %110 = math.tanh %109 : vector<2x32xf32>
    %111 = vector.extract_strided_slice %96 {offsets = [0, 96], sizes = [2, 32], strides = [1, 1]} : vector<2x128xf32> to vector<2x32xf32>
    %112 = arith.negf %111 : vector<2x32xf32>
    %113 = math.exp %112 : vector<2x32xf32>
    %cst_30 = arith.constant 1.000000e+00 : f32
    %114 = vector.broadcast %cst_30 : f32 to vector<2x32xf32>
    %115 = arith.addf %114, %113 : vector<2x32xf32>
    %116 = arith.divf %114, %115 : vector<2x32xf32>
    %117 = arith.mulf %108, %89 : vector<2x32xf32>
    %118 = arith.mulf %102, %110 : vector<2x32xf32>
    %119 = arith.addf %117, %118 : vector<2x32xf32>
    %120 = math.tanh %119 : vector<2x32xf32>
    %121 = arith.mulf %116, %120 : vector<2x32xf32>
    %c0_31 = arith.constant 0 : index
    %c96 = arith.constant 96 : index
    %122 = vector.load %arg6[%c0_31, %c96] : memref<2x256xf32, #tpu.memory_space<vmem>>, vector<2x32xf32>
    tpu.vector_store %arg6[%c0_31, %c96], %121 {strides = array<i32>} : memref<2x256xf32, #tpu.memory_space<vmem>>, vector<2x32xf32>,
    %c4 = arith.constant 4 : index
    %c0_32 = arith.constant 0 : index
    %c0_33 = arith.constant 0 : index
    %123 = vector.load %arg1[%c4, %c0_32, %c0_33] : memref<8x2x128xf32, #tpu.memory_space<vmem>>, vector<1x2x128xf32>
    %124 = vector.shape_cast %123 : vector<1x2x128xf32> to vector<2x128xf32>
    %cst_34 = arith.constant dense<0.000000e+00> : vector<2x128xf32>
    %125 = tpu.matmul %121, %0, %cst_34 {dimension_numbers = #tpu.dot_dimension_numbers<[1], [0], [0], [1], [0, 0, 1, 1], [], []>} : vector<2x32xf32>, vector<32x128xf32>, vector<2x128xf32> -> vector<2x128xf32>
    %126 = arith.addf %124, %125 : vector<2x128xf32>
    %127 = vector.extract_strided_slice %126 {offsets = [0, 0], sizes = [2, 32], strides = [1, 1]} : vector<2x128xf32> to vector<2x32xf32>
    %128 = arith.negf %127 : vector<2x32xf32>
    %129 = math.exp %128 : vector<2x32xf32>
    %cst_35 = arith.constant 1.000000e+00 : f32
    %130 = vector.broadcast %cst_35 : f32 to vector<2x32xf32>
    %131 = arith.addf %130, %129 : vector<2x32xf32>
    %132 = arith.divf %130, %131 : vector<2x32xf32>
    %133 = vector.extract_strided_slice %126 {offsets = [0, 32], sizes = [2, 32], strides = [1, 1]} : vector<2x128xf32> to vector<2x32xf32>
    %134 = arith.negf %133 : vector<2x32xf32>
    %135 = math.exp %134 : vector<2x32xf32>
    %cst_36 = arith.constant 1.000000e+00 : f32
    %136 = vector.broadcast %cst_36 : f32 to vector<2x32xf32>
    %137 = arith.addf %136, %135 : vector<2x32xf32>
    %138 = arith.divf %136, %137 : vector<2x32xf32>
    %139 = vector.extract_strided_slice %126 {offsets = [0, 64], sizes = [2, 32], strides = [1, 1]} : vector<2x128xf32> to vector<2x32xf32>
    %140 = math.tanh %139 : vector<2x32xf32>
    %141 = vector.extract_strided_slice %126 {offsets = [0, 96], sizes = [2, 32], strides = [1, 1]} : vector<2x128xf32> to vector<2x32xf32>
    %142 = arith.negf %141 : vector<2x32xf32>
    %143 = math.exp %142 : vector<2x32xf32>
    %cst_37 = arith.constant 1.000000e+00 : f32
    %144 = vector.broadcast %cst_37 : f32 to vector<2x32xf32>
    %145 = arith.addf %144, %143 : vector<2x32xf32>
    %146 = arith.divf %144, %145 : vector<2x32xf32>
    %147 = arith.mulf %138, %119 : vector<2x32xf32>
    %148 = arith.mulf %132, %140 : vector<2x32xf32>
    %149 = arith.addf %147, %148 : vector<2x32xf32>
    %150 = math.tanh %149 : vector<2x32xf32>
    %151 = arith.mulf %146, %150 : vector<2x32xf32>
    %c0_38 = arith.constant 0 : index
    %c128 = arith.constant 128 : index
    %152 = vector.load %arg6[%c0_38, %c128] : memref<2x256xf32, #tpu.memory_space<vmem>>, vector<2x32xf32>
    tpu.vector_store %arg6[%c0_38, %c128], %151 {strides = array<i32>} : memref<2x256xf32, #tpu.memory_space<vmem>>, vector<2x32xf32>,
    %c5 = arith.constant 5 : index
    %c0_39 = arith.constant 0 : index
    %c0_40 = arith.constant 0 : index
    %153 = vector.load %arg1[%c5, %c0_39, %c0_40] : memref<8x2x128xf32, #tpu.memory_space<vmem>>, vector<1x2x128xf32>
    %154 = vector.shape_cast %153 : vector<1x2x128xf32> to vector<2x128xf32>
    %cst_41 = arith.constant dense<0.000000e+00> : vector<2x128xf32>
    %155 = tpu.matmul %151, %0, %cst_41 {dimension_numbers = #tpu.dot_dimension_numbers<[1], [0], [0], [1], [0, 0, 1, 1], [], []>} : vector<2x32xf32>, vector<32x128xf32>, vector<2x128xf32> -> vector<2x128xf32>
    %156 = arith.addf %154, %155 : vector<2x128xf32>
    %157 = vector.extract_strided_slice %156 {offsets = [0, 0], sizes = [2, 32], strides = [1, 1]} : vector<2x128xf32> to vector<2x32xf32>
    %158 = arith.negf %157 : vector<2x32xf32>
    %159 = math.exp %158 : vector<2x32xf32>
    %cst_42 = arith.constant 1.000000e+00 : f32
    %160 = vector.broadcast %cst_42 : f32 to vector<2x32xf32>
    %161 = arith.addf %160, %159 : vector<2x32xf32>
    %162 = arith.divf %160, %161 : vector<2x32xf32>
    %163 = vector.extract_strided_slice %156 {offsets = [0, 32], sizes = [2, 32], strides = [1, 1]} : vector<2x128xf32> to vector<2x32xf32>
    %164 = arith.negf %163 : vector<2x32xf32>
    %165 = math.exp %164 : vector<2x32xf32>
    %cst_43 = arith.constant 1.000000e+00 : f32
    %166 = vector.broadcast %cst_43 : f32 to vector<2x32xf32>
    %167 = arith.addf %166, %165 : vector<2x32xf32>
    %168 = arith.divf %166, %167 : vector<2x32xf32>
    %169 = vector.extract_strided_slice %156 {offsets = [0, 64], sizes = [2, 32], strides = [1, 1]} : vector<2x128xf32> to vector<2x32xf32>
    %170 = math.tanh %169 : vector<2x32xf32>
    %171 = vector.extract_strided_slice %156 {offsets = [0, 96], sizes = [2, 32], strides = [1, 1]} : vector<2x128xf32> to vector<2x32xf32>
    %172 = arith.negf %171 : vector<2x32xf32>
    %173 = math.exp %172 : vector<2x32xf32>
    %cst_44 = arith.constant 1.000000e+00 : f32
    %174 = vector.broadcast %cst_44 : f32 to vector<2x32xf32>
    %175 = arith.addf %174, %173 : vector<2x32xf32>
    %176 = arith.divf %174, %175 : vector<2x32xf32>
    %177 = arith.mulf %168, %149 : vector<2x32xf32>
    %178 = arith.mulf %162, %170 : vector<2x32xf32>
    %179 = arith.addf %177, %178 : vector<2x32xf32>
    %180 = math.tanh %179 : vector<2x32xf32>
    %181 = arith.mulf %176, %180 : vector<2x32xf32>
    %c0_45 = arith.constant 0 : index
    %c160 = arith.constant 160 : index
    %182 = vector.load %arg6[%c0_45, %c160] : memref<2x256xf32, #tpu.memory_space<vmem>>, vector<2x32xf32>
    tpu.vector_store %arg6[%c0_45, %c160], %181 {strides = array<i32>} : memref<2x256xf32, #tpu.memory_space<vmem>>, vector<2x32xf32>,
    %c6 = arith.constant 6 : index
    %c0_46 = arith.constant 0 : index
    %c0_47 = arith.constant 0 : index
    %183 = vector.load %arg1[%c6, %c0_46, %c0_47] : memref<8x2x128xf32, #tpu.memory_space<vmem>>, vector<1x2x128xf32>
    %184 = vector.shape_cast %183 : vector<1x2x128xf32> to vector<2x128xf32>
    %cst_48 = arith.constant dense<0.000000e+00> : vector<2x128xf32>
    %185 = tpu.matmul %181, %0, %cst_48 {dimension_numbers = #tpu.dot_dimension_numbers<[1], [0], [0], [1], [0, 0, 1, 1], [], []>} : vector<2x32xf32>, vector<32x128xf32>, vector<2x128xf32> -> vector<2x128xf32>
    %186 = arith.addf %184, %185 : vector<2x128xf32>
    %187 = vector.extract_strided_slice %186 {offsets = [0, 0], sizes = [2, 32], strides = [1, 1]} : vector<2x128xf32> to vector<2x32xf32>
    %188 = arith.negf %187 : vector<2x32xf32>
    %189 = math.exp %188 : vector<2x32xf32>
    %cst_49 = arith.constant 1.000000e+00 : f32
    %190 = vector.broadcast %cst_49 : f32 to vector<2x32xf32>
    %191 = arith.addf %190, %189 : vector<2x32xf32>
    %192 = arith.divf %190, %191 : vector<2x32xf32>
    %193 = vector.extract_strided_slice %186 {offsets = [0, 32], sizes = [2, 32], strides = [1, 1]} : vector<2x128xf32> to vector<2x32xf32>
    %194 = arith.negf %193 : vector<2x32xf32>
    %195 = math.exp %194 : vector<2x32xf32>
    %cst_50 = arith.constant 1.000000e+00 : f32
    %196 = vector.broadcast %cst_50 : f32 to vector<2x32xf32>
    %197 = arith.addf %196, %195 : vector<2x32xf32>
    %198 = arith.divf %196, %197 : vector<2x32xf32>
    %199 = vector.extract_strided_slice %186 {offsets = [0, 64], sizes = [2, 32], strides = [1, 1]} : vector<2x128xf32> to vector<2x32xf32>
    %200 = math.tanh %199 : vector<2x32xf32>
    %201 = vector.extract_strided_slice %186 {offsets = [0, 96], sizes = [2, 32], strides = [1, 1]} : vector<2x128xf32> to vector<2x32xf32>
    %202 = arith.negf %201 : vector<2x32xf32>
    %203 = math.exp %202 : vector<2x32xf32>
    %cst_51 = arith.constant 1.000000e+00 : f32
    %204 = vector.broadcast %cst_51 : f32 to vector<2x32xf32>
    %205 = arith.addf %204, %203 : vector<2x32xf32>
    %206 = arith.divf %204, %205 : vector<2x32xf32>
    %207 = arith.mulf %198, %179 : vector<2x32xf32>
    %208 = arith.mulf %192, %200 : vector<2x32xf32>
    %209 = arith.addf %207, %208 : vector<2x32xf32>
    %210 = math.tanh %209 : vector<2x32xf32>
    %211 = arith.mulf %206, %210 : vector<2x32xf32>
    %c0_52 = arith.constant 0 : index
    %c192 = arith.constant 192 : index
    %212 = vector.load %arg6[%c0_52, %c192] : memref<2x256xf32, #tpu.memory_space<vmem>>, vector<2x32xf32>
    tpu.vector_store %arg6[%c0_52, %c192], %211 {strides = array<i32>} : memref<2x256xf32, #tpu.memory_space<vmem>>, vector<2x32xf32>,
    %c7 = arith.constant 7 : index
    %c0_53 = arith.constant 0 : index
    %c0_54 = arith.constant 0 : index
    %213 = vector.load %arg1[%c7, %c0_53, %c0_54] : memref<8x2x128xf32, #tpu.memory_space<vmem>>, vector<1x2x128xf32>
    %214 = vector.shape_cast %213 : vector<1x2x128xf32> to vector<2x128xf32>
    %cst_55 = arith.constant dense<0.000000e+00> : vector<2x128xf32>
    %215 = tpu.matmul %211, %0, %cst_55 {dimension_numbers = #tpu.dot_dimension_numbers<[1], [0], [0], [1], [0, 0, 1, 1], [], []>} : vector<2x32xf32>, vector<32x128xf32>, vector<2x128xf32> -> vector<2x128xf32>
    %216 = arith.addf %214, %215 : vector<2x128xf32>
    %217 = vector.extract_strided_slice %216 {offsets = [0, 0], sizes = [2, 32], strides = [1, 1]} : vector<2x128xf32> to vector<2x32xf32>
    %218 = arith.negf %217 : vector<2x32xf32>
    %219 = math.exp %218 : vector<2x32xf32>
    %cst_56 = arith.constant 1.000000e+00 : f32
    %220 = vector.broadcast %cst_56 : f32 to vector<2x32xf32>
    %221 = arith.addf %220, %219 : vector<2x32xf32>
    %222 = arith.divf %220, %221 : vector<2x32xf32>
    %223 = vector.extract_strided_slice %216 {offsets = [0, 32], sizes = [2, 32], strides = [1, 1]} : vector<2x128xf32> to vector<2x32xf32>
    %224 = arith.negf %223 : vector<2x32xf32>
    %225 = math.exp %224 : vector<2x32xf32>
    %cst_57 = arith.constant 1.000000e+00 : f32
    %226 = vector.broadcast %cst_57 : f32 to vector<2x32xf32>
    %227 = arith.addf %226, %225 : vector<2x32xf32>
    %228 = arith.divf %226, %227 : vector<2x32xf32>
    %229 = vector.extract_strided_slice %216 {offsets = [0, 64], sizes = [2, 32], strides = [1, 1]} : vector<2x128xf32> to vector<2x32xf32>
    %230 = math.tanh %229 : vector<2x32xf32>
    %231 = vector.extract_strided_slice %216 {offsets = [0, 96], sizes = [2, 32], strides = [1, 1]} : vector<2x128xf32> to vector<2x32xf32>
    %232 = arith.negf %231 : vector<2x32xf32>
    %233 = math.exp %232 : vector<2x32xf32>
    %cst_58 = arith.constant 1.000000e+00 : f32
    %234 = vector.broadcast %cst_58 : f32 to vector<2x32xf32>
    %235 = arith.addf %234, %233 : vector<2x32xf32>
    %236 = arith.divf %234, %235 : vector<2x32xf32>
    %237 = arith.mulf %228, %209 : vector<2x32xf32>
    %238 = arith.mulf %222, %230 : vector<2x32xf32>
    %239 = arith.addf %237, %238 : vector<2x32xf32>
    %240 = math.tanh %239 : vector<2x32xf32>
    %241 = arith.mulf %236, %240 : vector<2x32xf32>
    %c0_59 = arith.constant 0 : index
    %c224 = arith.constant 224 : index
    %242 = vector.load %arg6[%c0_59, %c224] : memref<2x256xf32, #tpu.memory_space<vmem>>, vector<2x32xf32>
    tpu.vector_store %arg6[%c0_59, %c224], %241 {strides = array<i32>} : memref<2x256xf32, #tpu.memory_space<vmem>>, vector<2x32xf32>,
    %c0_60 = arith.constant 0 : index
    %c0_61 = arith.constant 0 : index
    %243 = vector.load %arg6[%c0_60, %c0_61] : memref<2x256xf32, #tpu.memory_space<vmem>>, vector<2x256xf32>
    %c0_62 = arith.constant 0 : index
    %c0_63 = arith.constant 0 : index
    %244 = vector.load %arg3[%c0_62, %c0_63] : memref<256x2xf32, #tpu.memory_space<vmem>>, vector<256x2xf32>
    %cst_64 = arith.constant dense<0.000000e+00> : vector<2x2xf32>
    %245 = tpu.matmul %243, %244, %cst_64 {dimension_numbers = #tpu.dot_dimension_numbers<[1], [0], [0], [1], [0, 0, 1, 1], [], []>} : vector<2x256xf32>, vector<256x2xf32>, vector<2x2xf32> -> vector<2x2xf32>
    %c0_65 = arith.constant 0 : index
    %c0_66 = arith.constant 0 : index
    %246 = vector.load %arg4[%c0_65, %c0_66] : memref<1x2xf32, #tpu.memory_space<vmem>>, vector<1x2xf32>
    %247 = vector.broadcast %246 : vector<1x2xf32> to vector<2x2xf32>
    %248 = arith.addf %245, %247 : vector<2x2xf32>
    %c0_67 = arith.constant 0 : index
    %c0_68 = arith.constant 0 : index
    %249 = vector.load %arg5[%c0_67, %c0_68] : memref<2x2xf32, #tpu.memory_space<vmem>>, vector<2x2xf32>
    tpu.vector_store %arg5[%c0_67, %c0_68], %248 {strides = array<i32>} : memref<2x2xf32, #tpu.memory_space<vmem>>, vector<2x2xf32>,
    return
  }
  func.func @transform_0(%arg0: i32) -> (i32, i32, i32) {
    %c0_i32 = arith.constant 0 : i32
    %c0_i32_0 = arith.constant 0 : i32
    %c0_i32_1 = arith.constant 0 : i32
    %c0_i32_2 = arith.constant 0 : i32
    return %c0_i32, %c0_i32_0, %c0_i32_1 : i32, i32, i32
  }
  func.func @transform_1(%arg0: i32) -> (i32, i32) {
    %c0_i32 = arith.constant 0 : i32
    %c0_i32_0 = arith.constant 0 : i32
    %c0_i32_1 = arith.constant 0 : i32
    return %c0_i32, %c0_i32_0 : i32, i32
  }
  func.func @transform_2(%arg0: i32) -> (i32, i32) {
    %c0_i32 = arith.constant 0 : i32
    %c0_i32_0 = arith.constant 0 : i32
    %c0_i32_1 = arith.constant 0 : i32
    return %c0_i32, %c0_i32_0 : i32, i32
  }
  func.func @transform_3(%arg0: i32) -> (i32, i32) {
    %c0_i32 = arith.constant 0 : i32
    %c0_i32_0 = arith.constant 0 : i32
    %c0_i32_1 = arith.constant 0 : i32
    return %c0_i32, %c0_i32_0 : i32, i32
  }
  func.func @transform_4(%arg0: i32) -> (i32, i32) {
    %c0_i32 = arith.constant 0 : i32
    %c0_i32_0 = arith.constant 0 : i32
    %c0_i32_1 = arith.constant 0 : i32
    return %c0_i32, %c0_i32_0 : i32, i32
  }
}

</mosaic_0001>

<bundles_post_ra>
// kernel: tpu_custom_call.1
= control target key start
LH: loop header
LB: loop body
LE: loop exit
PB: predicated region body
PF: predicated region fallthrough
CT: control target
= control target key end

     0   :  { %s1062_s0 = inlined_call_operand.vmem [shape: f32[8,2,128], index: 0, kind: input, shape index: {}]   ;;  %s1063_s1 = inlined_call_operand.vmem [shape: f32[32,128], index: 1, kind: input, shape index: {}]   ;;  %s1064_s2 = inlined_call_operand.vmem [shape: f32[256,2], index: 2, kind: input, shape index: {}]   ;;  %s1065_s3 = inlined_call_operand.vmem [shape: f32[1,2], index: 3, kind: input, shape index: {}]   ;;  %s1066_s4 = inlined_call_operand.hbm [shape: f32[2,2], index: 4, kind: output, shape index: {}]  }
   0x1   :  { %v818_v0 = vld [vmem:[%s1063_s1 + $0x18] sm:$0xff]  ;;  %v823_v1 = vld [vmem:[%s1063_s1 + $0x10] sm:$0xff]  ;;  %v830_v2 = vld [vmem:[%s1063_s1 + $0x8] sm:$0xff] }
   0x2   :  { %39 = vmatpush.msra.mxu2 %v818_v0  ;;  %107 = vmatpush.msra.mxu3 %v818_v0 }
   0x3   :  { %9 = vsyncpa [#allocation4], 0  ;;  %v837_v3 = vld [vmem:[%s1063_s1] sm:$0xff]  ;;  %v785_v4 = vmov 0.0   ;;  %s786_s24 = smov 64   ;;  %s787_s25 = smov 32  }
   0x4   :  { %40 = vmatpush.msra.mxu2 %v823_v1  ;;  %108 = vmatpush.msra.mxu3 %v823_v1  ;;  %v22_v5 = vld [vmem:[%s1062_s0] sm:$0x3]  ;;  %vm89_vm4 = vcmask 254976   ;;  %vm23_vm5 = vcmask 261120   ;;  %v668_v31 = vld [vmem:[%s1062_s0 + $0x2] sm:$0x3] }
   0x5   :  { %v671_v57 = vld [vmem:[%s1062_s0 + $0x4] sm:$0x3]  ;;  %s788_s12 = smov 96   ;;  %s658_s27 = sshll.u32 %s1066_s4, 4  ;;  %s659_s27 = int_to_ptr.hbm [resolvable:$true] %s658_s27 }
   0x6   :  { %41 = vmatpush.msra.mxu2 %v830_v2  ;;  %109 = vmatpush.msra.mxu3 %v830_v2 }
   0x8   :  { %42 = vmatpush.msra.mxu2 %v837_v3  ;;  %110 = vmatpush.msra.mxu3 %v837_v3 }
   0x9   :  { %43 = vmatmul.f32.vlgmr.msra.gmra.mxu2 %v785_v4 }
   0xa   :  { %247 = vmatpush.msrb.mxu3 %v818_v0  ;;  %177 = vmatpush.msrb.mxu2 %v818_v0 }
   0xc   :  { %248 = vmatpush.msrb.mxu3 %v823_v1  ;;  %178 = vmatpush.msrb.mxu2 %v823_v1 }
   0xe   :  { %249 = vmatpush.msrb.mxu3 %v830_v2  ;;  %179 = vmatpush.msrb.mxu2 %v830_v2 }
  0x10   :  { %250 = vmatpush.msrb.mxu3 %v837_v3  ;;  %180 = vmatpush.msrb.mxu2 %v837_v3 }
  0x12   :  { %314 = vmatpush.msra.mxu2 %v818_v0 }
  0x14   :  { %315 = vmatpush.msra.mxu2 %v823_v1 }
  0x16   :  { %316 = vmatpush.msra.mxu2 %v830_v2 }
  0x18   :  { %317 = vmatpush.msra.mxu2 %v837_v3 }
  0x8c   :  { %v44_v6 = vpop.f32.mrf.mxu2 }
  0x8d   :  { %v47_v7 = vadd.f32 %v44_v6, %v22_v5 }
  0x8f   :  { %695 = vtanh.f32 %v47_v7  ;;  %v667_v9 = vmul.f32 -1.442695, %v47_v7 }
  0x91   :  { %697 = vpow2.f32 %v667_v9 }
  0x95   :  { %v696_v8 = vpop.eup %695 }
  0x96   :  { %70 = vrot.lane.b32.xlu0 %v696_v8, %s786_s24 }
  0x97   :  { %v698_v10 = vpop.eup %697 }
  0x98   :  { %v51_v11 = vadd.f32 1.0, %v698_v10 }
  0x9a   :  { %699 = vrcp.f32 %v51_v11  ;;  %v63_v17 = vand.u32 2147483648, %v51_v11  ;;  %vm57_vm1 = vweird.f32 %v51_v11  ;;  %v61_v18 = vand.u32 2147483647, %v51_v11 }
  0x9c   :  { %v64_v20 = vor.u32 1.1754944e-38, %v63_v17  ;;  %vm62_vm3 = vcmp.eq.f32.partialorder %v61_v18, 8.507059e+37 }
  0xa0   :  { %v700_v12 = vpop.eup %699 }
  0xa1   :  { %v53_v13 = vmul.f32 %v700_v12, %v51_v11  ;;  %vm58_vm0 = vweird.f32 %v700_v12 }
  0xa2   :  { %vm59_vm2 = vmor %vm57_vm1, %vm58_vm0 }
  0xa3   :  { %v54_v14 = vsub.f32 1.0, %v53_v13 }
  0xa5   :  { %v55_v15 = vmul.f32 %v700_v12, %v54_v14 }
  0xa7   :  { %v56_v16 = vadd.f32 %v700_v12, %v55_v15 }
  0xa9   :  { %v60_v19 = vsel %vm59_vm2, %v700_v12, %v56_v16 }
  0xaa   :  { %v65_v22 = vsel %vm62_vm3, %v64_v20, %v60_v19 }
  0xab   :  { %v68_v24 = vmul.f32 0.0, %v65_v22 }
 0x108   :  { %v71_v21 = vpop.permute.xlu0 %70 }
 0x109   :  { %v73_v23 = vmul.f32 %v71_v21, %v65_v22 }
 0x10b   :  { %75 = vrot.lane.b32.xlu0 %v73_v23, %s787_s25  ;;  %v674_v23 = vld [vmem:[%s1062_s0 + $0x6] sm:$0x3] }
 0x17d   :  { %v76_v25 = vpop.permute.xlu0 %75 }
 0x17e   :  { %v78_v26 = vadd.f32 %v76_v25, %v68_v24 }
 0x180   :  { %701 = vtanh.f32 %v78_v26 }
 0x186   :  { %v702_v27 = vpop.eup %701 }
 0x187   :  { %81 = vrot.lane.b32.xlu1 %v702_v27, %s786_s24 }
 0x1f9   :  { %v82_v28 = vpop.permute.xlu1 %81 }
 0x1fa   :  { %v84_v29 = vmul.f32 %v82_v28, %v65_v22 }
 0x1fc   :  { %86 = vrot.lane.b32.xlu1 %v84_v29, %s787_s25 }
 0x26e   :  { %v87_v30 = vpop.permute.xlu1 %86 }
 0x26f   :  { %90 = vst.msk [vmem:[#allocation2] sm:$0x3] %vm89_vm4, %v87_v30  ;;  %669 = vmatmul.msk.f32.vlgmr.msra.gmra.mxu3 %vm23_vm5, %v87_v30 }
 0x270   :  { %381 = vmatpush.msra.mxu3 %v818_v0 }
 0x272   :  { %382 = vmatpush.msra.mxu3 %v823_v1 }
 0x274   :  { %383 = vmatpush.msra.mxu3 %v830_v2 }
 0x276   :  { %384 = vmatpush.msra.mxu3 %v837_v3 }
 0x2f2   :  { %v112_v32 = vpop.f32.mrf.mxu3 }
 0x2f3   :  { %v115_v33 = vadd.f32 %v668_v31, %v112_v32 }
 0x2f5   :  { %703 = vtanh.f32 %v115_v33  ;;  %v670_v35 = vmul.f32 -1.442695, %v115_v33 }
 0x2f7   :  { %705 = vpow2.f32 %v670_v35 }
 0x2fb   :  { %v704_v34 = vpop.eup %703 }
 0x2fc   :  { %138 = vrot.lane.b32.xlu2 %v704_v34, %s786_s24 }
 0x2fd   :  { %v706_v36 = vpop.eup %705 }
 0x2fe   :  { %v119_v37 = vadd.f32 1.0, %v706_v36 }
 0x300   :  { %707 = vrcp.f32 %v119_v37  ;;  %v131_v43 = vand.u32 2147483648, %v119_v37  ;;  %vm125_vm7 = vweird.f32 %v119_v37  ;;  %v129_v44 = vand.u32 2147483647, %v119_v37 }
 0x302   :  { %v132_v46 = vor.u32 1.1754944e-38, %v131_v43  ;;  %vm130_vm9 = vcmp.eq.f32.partialorder %v129_v44, 8.507059e+37 }
 0x306   :  { %v708_v38 = vpop.eup %707 }
 0x307   :  { %v121_v39 = vmul.f32 %v708_v38, %v119_v37  ;;  %vm126_vm6 = vweird.f32 %v708_v38 }
 0x308   :  { %vm127_vm8 = vmor %vm125_vm7, %vm126_vm6 }
 0x309   :  { %v122_v40 = vsub.f32 1.0, %v121_v39 }
 0x30b   :  { %v123_v41 = vmul.f32 %v708_v38, %v122_v40 }
 0x30d   :  { %v124_v42 = vadd.f32 %v708_v38, %v123_v41 }
 0x30f   :  { %v128_v45 = vsel %vm127_vm8, %v708_v38, %v124_v42 }
 0x310   :  { %v133_v48 = vsel %vm130_vm9, %v132_v46, %v128_v45  ;;  %v677_v45 = vld [vmem:[%s1062_s0 + $0x8] sm:$0x3] }
 0x311   :  { %v136_v50 = vmul.f32 %v133_v48, %v78_v26 }
 0x356   :  { %v139_v47 = vpop.permute.xlu2 %138 }
 0x357   :  { %v141_v49 = vmul.f32 %v139_v47, %v133_v48 }
 0x359   :  { %143 = vrot.lane.b32.xlu2 %v141_v49, %s787_s25 }
 0x3b3   :  { %v144_v51 = vpop.permute.xlu2 %143 }
 0x3b4   :  { %v146_v52 = vadd.f32 %v144_v51, %v136_v50 }
 0x3b6   :  { %709 = vtanh.f32 %v146_v52 }
 0x3bc   :  { %v710_v53 = vpop.eup %709 }
 0x3bd   :  { %149 = vrot.lane.b32.xlu0 %v710_v53, %s786_s24 }
 0x42f   :  { %v150_v54 = vpop.permute.xlu0 %149 }
 0x430   :  { %v874_v55 = vmul.f32 %v150_v54, %v133_v48 }
 0x432   :  { %161 = vrot.lane.b32.xlu1 %v874_v55, %s787_s25 }
 0x4a4   :  { %v162_v56 = vpop.permute.xlu1 %161 }
 0x4a5   :  { %672 = vmatmul.msk.f32.vlgmr.msrb.gmra.mxu2 %vm23_vm5, %v162_v56 }
 0x4a6   :  { %450 = vmatpush.msrb.mxu2 %v818_v0 }
 0x4a8   :  { %451 = vmatpush.msrb.mxu2 %v823_v1 }
 0x4aa   :  { %452 = vmatpush.msrb.mxu2 %v830_v2 }
 0x4ac   :  { %453 = vmatpush.msrb.mxu2 %v837_v3 }
 0x528   :  { %v182_v58 = vpop.f32.mrf.mxu2 }
 0x529   :  { %v185_v59 = vadd.f32 %v671_v57, %v182_v58 }
 0x52b   :  { %711 = vtanh.f32 %v185_v59  ;;  %v673_v61 = vmul.f32 -1.442695, %v185_v59 }
 0x52d   :  { %713 = vpow2.f32 %v673_v61 }
 0x531   :  { %v712_v60 = vpop.eup %711 }
 0x532   :  { %208 = vrot.lane.b32.xlu2 %v712_v60, %s786_s24 }
 0x533   :  { %v714_v62 = vpop.eup %713 }
 0x534   :  { %v189_v63 = vadd.f32 1.0, %v714_v62 }
 0x536   :  { %715 = vrcp.f32 %v189_v63  ;;  %v201_v9 = vand.u32 2147483648, %v189_v63  ;;  %vm195_vm11 = vweird.f32 %v189_v63  ;;  %v199_v10 = vand.u32 2147483647, %v189_v63 }
 0x538   :  { %v202_v12 = vor.u32 1.1754944e-38, %v201_v9  ;;  %vm200_vm13 = vcmp.eq.f32.partialorder %v199_v10, 8.507059e+37 }
 0x53c   :  { %v716_v4 = vpop.eup %715 }
 0x53d   :  { %v191_v5 = vmul.f32 %v716_v4, %v189_v63  ;;  %vm196_vm10 = vweird.f32 %v716_v4 }
 0x53e   :  { %vm197_vm12 = vmor %vm195_vm11, %vm196_vm10 }
 0x53f   :  { %v192_v6 = vsub.f32 1.0, %v191_v5 }
 0x541   :  { %v193_v7 = vmul.f32 %v716_v4, %v192_v6 }
 0x543   :  { %v194_v8 = vadd.f32 %v716_v4, %v193_v7 }
 0x545   :  { %v198_v11 = vsel %vm197_vm12, %v716_v4, %v194_v8 }
 0x546   :  { %v203_v14 = vsel %vm200_vm13, %v202_v12, %v198_v11  ;;  %v680_v12 = vld [vmem:[%s1062_s0 + $0xa] sm:$0x3] }
 0x547   :  { %v206_v16 = vmul.f32 %v203_v14, %v146_v52 }
 0x58c   :  { %v209_v13 = vpop.permute.xlu2 %208 }
 0x58d   :  { %v211_v15 = vmul.f32 %v209_v13, %v203_v14 }
 0x58f   :  { %213 = vrot.lane.b32.xlu0 %v211_v15, %s787_s25 }
 0x601   :  { %v214_v17 = vpop.permute.xlu0 %213 }
 0x602   :  { %v216_v18 = vadd.f32 %v214_v17, %v206_v16 }
 0x604   :  { %717 = vtanh.f32 %v216_v18 }
 0x60a   :  { %v718_v19 = vpop.eup %717 }
 0x60b   :  { %219 = vrot.lane.b32.xlu1 %v718_v19, %s786_s24 }
 0x67d   :  { %v220_v20 = vpop.permute.xlu1 %219 }
 0x67e   :  { %v889_v21 = vmul.f32 %v220_v20, %v203_v14 }
 0x680   :  { %231 = vrot.lane.b32.xlu2 %v889_v21, %s787_s25 }
 0x6da   :  { %v232_v22 = vpop.permute.xlu2 %231 }
 0x6db   :  { %675 = vmatmul.msk.f32.vlgmr.msrb.gmra.mxu3 %vm23_vm5, %v232_v22 }
 0x6dc   :  { %519 = vmatpush.msrb.mxu3 %v818_v0 }
 0x6de   :  { %520 = vmatpush.msrb.mxu3 %v823_v1 }
 0x6e0   :  { %521 = vmatpush.msrb.mxu3 %v830_v2 }
 0x6e2   :  { %522 = vmatpush.msrb.mxu3 %v837_v3 }
 0x75e   :  { %v252_v24 = vpop.f32.mrf.mxu3 }
 0x75f   :  { %v255_v25 = vadd.f32 %v674_v23, %v252_v24 }
 0x761   :  { %719 = vtanh.f32 %v255_v25  ;;  %v676_v27 = vmul.f32 -1.442695, %v255_v25 }
 0x763   :  { %721 = vpow2.f32 %v676_v27 }
 0x767   :  { %v720_v26 = vpop.eup %719 }
 0x768   :  { %278 = vrot.lane.b32.xlu0 %v720_v26, %s786_s24 }
 0x769   :  { %v722_v28 = vpop.eup %721 }
 0x76a   :  { %v259_v0 = vadd.f32 1.0, %v722_v28 }
 0x76c   :  { %723 = vrcp.f32 %v259_v0  ;;  %v271_v31 = vand.u32 2147483648, %v259_v0  ;;  %vm265_vm15 = vweird.f32 %v259_v0  ;;  %v269_v32 = vand.u32 2147483647, %v259_v0 }
 0x76e   :  { %v272_v34 = vor.u32 1.1754944e-38, %v271_v31  ;;  %vm270_vm1 = vcmp.eq.f32.partialorder %v269_v32, 8.507059e+37 }
 0x772   :  { %v724_v1 = vpop.eup %723 }
 0x773   :  { %v261_v29 = vmul.f32 %v724_v1, %v259_v0  ;;  %vm266_vm14 = vweird.f32 %v724_v1 }
 0x774   :  { %vm267_vm0 = vmor %vm265_vm15, %vm266_vm14  ;;  %vm157_vm15 = vcmask 517376  }
 0x775   :  { %v262_v2 = vsub.f32 1.0, %v261_v29 }
 0x777   :  { %v263_v30 = vmul.f32 %v724_v1, %v262_v2 }
 0x779   :  { %v264_v3 = vadd.f32 %v724_v1, %v263_v30 }
 0x77b   :  { %v268_v33 = vsel %vm267_vm0, %v724_v1, %v264_v3  ;;  %vm227_vm0 = vcmask 779776  }
 0x77c   :  { %v273_v36 = vsel %vm270_vm1, %v272_v34, %v268_v33  ;;  %vm293_vm1 = vcmask 1042176  }
 0x77d   :  { %v276_v38 = vmul.f32 %v273_v36, %v216_v18 }
 0x7da   :  { %v279_v35 = vpop.permute.xlu0 %278 }
 0x7db   :  { %v281_v37 = vmul.f32 %v279_v35, %v273_v36  ;;  %v683_v35 = vld [vmem:[%s1062_s0 + $0xc] sm:$0x3] }
 0x7dd   :  { %283 = vrot.lane.b32.xlu1 %v281_v37, %s787_s25 }
 0x84f   :  { %v284_v39 = vpop.permute.xlu1 %283 }
 0x850   :  { %v286_v40 = vadd.f32 %v284_v39, %v276_v38 }
 0x852   :  { %725 = vtanh.f32 %v286_v40 }
 0x858   :  { %v726_v41 = vpop.eup %725 }
 0x859   :  { %289 = vrot.lane.b32.xlu2 %v726_v41, %s786_s24 }
 0x8b3   :  { %v290_v42 = vpop.permute.xlu2 %289 }
 0x8b4   :  { %v904_v43 = vmul.f32 %v290_v42, %v273_v36 }
 0x8b6   :  { %298 = vrot.lane.b32.xlu0 %v904_v43, %s787_s25 }
 0x928   :  { %v299_v44 = vpop.permute.xlu0 %298 }
 0x929   :  { %678 = vmatmul.msk.f32.vlgmr.msra.gmra.mxu2 %vm23_vm5, %v299_v44 }
 0x9ac   :  { %v319_v46 = vpop.f32.mrf.mxu2 }
 0x9ad   :  { %v322_v47 = vadd.f32 %v677_v45, %v319_v46 }
 0x9af   :  { %727 = vtanh.f32 %v322_v47  ;;  %v679_v49 = vmul.f32 -1.442695, %v322_v47 }
 0x9b1   :  { %729 = vpow2.f32 %v679_v49 }
 0x9b5   :  { %v728_v48 = vpop.eup %727 }
 0x9b6   :  { %345 = vrot.lane.b32.xlu1 %v728_v48, %s786_s24 }
 0x9b7   :  { %v730_v50 = vpop.eup %729 }
 0x9b8   :  { %v326_v51 = vadd.f32 1.0, %v730_v50 }
 0x9ba   :  { %731 = vrcp.f32 %v326_v51  ;;  %v338_v58 = vand.u32 2147483648, %v326_v51  ;;  %vm332_vm3 = vweird.f32 %v326_v51  ;;  %v336_v59 = vand.u32 2147483647, %v326_v51 }
 0x9bc   :  { %v339_v61 = vor.u32 1.1754944e-38, %v338_v58  ;;  %vm337_vm7 = vcmp.eq.f32.partialorder %v336_v59, 8.507059e+37 }
 0x9c0   :  { %v732_v52 = vpop.eup %731 }
 0x9c1   :  { %v328_v53 = vmul.f32 %v732_v52, %v326_v51  ;;  %vm333_vm2 = vweird.f32 %v732_v52 }
 0x9c2   :  { %vm334_vm6 = vmor %vm332_vm3, %vm333_vm2 }
 0x9c3   :  { %v329_v54 = vsub.f32 1.0, %v328_v53 }
 0x9c5   :  { %v330_v56 = vmul.f32 %v732_v52, %v329_v54 }
 0x9c7   :  { %v331_v57 = vadd.f32 %v732_v52, %v330_v56 }
 0x9c9   :  { %v335_v60 = vsel %vm334_vm6, %v732_v52, %v331_v57 }
 0x9ca   :  { %v340_v63 = vsel %vm337_vm7, %v339_v61, %v335_v60  ;;  %vm649_vm7 = vcmask 9216  }
 0x9cb   :  { %v343_v5 = vmul.f32 %v340_v63, %v286_v40 }
 0xa28   :  { %v346_v62 = vpop.permute.xlu1 %345 }
 0xa29   :  { %v348_v4 = vmul.f32 %v346_v62, %v340_v63 }
 0xa2b   :  { %350 = vrot.lane.b32.xlu2 %v348_v4, %s787_s25 }
 0xa85   :  { %v351_v6 = vpop.permute.xlu2 %350 }
 0xa86   :  { %v353_v7 = vadd.f32 %v351_v6, %v343_v5 }
 0xa88   :  { %733 = vtanh.f32 %v353_v7 }
 0xa8e   :  { %v734_v8 = vpop.eup %733 }
 0xa8f   :  { %356 = vrot.lane.b32.xlu0 %v734_v8, %s786_s24 }
 0xb01   :  { %v357_v9 = vpop.permute.xlu0 %356 }
 0xb02   :  { %v359_v10 = vmul.f32 %v357_v9, %v340_v63 }
 0xb04   :  { %361 = vrot.lane.b32.xlu1 %v359_v10, %s787_s25 }
 0xb76   :  { %v362_v11 = vpop.permute.xlu1 %361 }
 0xb77   :  { %364 = vst.msk [vmem:[#allocation2 + $0x2] sm:$0x3] %vm89_vm4, %v362_v11  ;;  %681 = vmatmul.msk.f32.vlgmr.msra.gmra.mxu3 %vm23_vm5, %v362_v11 }
 0xbfa   :  { %v386_v13 = vpop.f32.mrf.mxu3 }
 0xbfb   :  { %v389_v14 = vadd.f32 %v680_v12, %v386_v13 }
 0xbfd   :  { %735 = vtanh.f32 %v389_v14  ;;  %v682_v16 = vmul.f32 -1.442695, %v389_v14 }
 0xbff   :  { %737 = vpow2.f32 %v682_v16 }
 0xc03   :  { %v736_v15 = vpop.eup %735 }
 0xc04   :  { %412 = vrot.lane.b32.xlu2 %v736_v15, %s786_s24 }
 0xc05   :  { %v738_v17 = vpop.eup %737 }
 0xc06   :  { %v393_v18 = vadd.f32 1.0, %v738_v17 }
 0xc08   :  { %739 = vrcp.f32 %v393_v18  ;;  %v405_v25 = vand.u32 2147483648, %v393_v18  ;;  %vm399_vm8 = vweird.f32 %v393_v18  ;;  %v403_v26 = vand.u32 2147483647, %v393_v18 }
 0xc0a   :  { %v406_v28 = vor.u32 1.1754944e-38, %v405_v25  ;;  %vm404_vm10 = vcmp.eq.f32.partialorder %v403_v26, 8.507059e+37  ;;  %v598_v25 = vld [vmem:[%s1064_s2 + $0xf8] sm:$0xff]  ;;  %v581_v26 = vld [vmem:[%s1064_s2 + $0x70] sm:$0xff] }
 0xc0b   :  { %629 = vmatpush.msra.mxu1 %v598_v25 }
 0xc0e   :  { %v740_v19 = vpop.eup %739 }
 0xc0f   :  { %v395_v20 = vmul.f32 %v740_v19, %v393_v18  ;;  %vm400_vm4 = vweird.f32 %v740_v19 }
 0xc10   :  { %vm401_vm9 = vmor %vm399_vm8, %vm400_vm4 }
 0xc11   :  { %v396_v22 = vsub.f32 1.0, %v395_v20 }
 0xc13   :  { %v397_v23 = vmul.f32 %v740_v19, %v396_v22 }
 0xc15   :  { %v398_v24 = vadd.f32 %v740_v19, %v397_v23 }
 0xc17   :  { %v402_v27 = vsel %vm401_vm9, %v740_v19, %v398_v24  ;;  %v582_v24 = vld [vmem:[%s1064_s2 + $0x78] sm:$0xff] }
 0xc18   :  { %v407_v1 = vsel %vm404_vm10, %v406_v28, %v402_v27  ;;  %609 = vmatpush.msra.mxu0 %v582_v24  ;;  %v597_v27 = vld [vmem:[%s1064_s2 + $0xf0] sm:$0xff]  ;;  %v580_v28 = vld [vmem:[%s1064_s2 + $0x68] sm:$0xff] }
 0xc19   :  { %v410_v2 = vmul.f32 %v407_v1, %v353_v7  ;;  %630 = vmatpush.msra.mxu1 %v597_v27 }
 0xc1a   :  { %610 = vmatpush.msra.mxu0 %v581_v26 }
 0xc1c   :  { %611 = vmatpush.msra.mxu0 %v580_v28 }
 0xc5e   :  { %v413_v0 = vpop.permute.xlu2 %412 }
 0xc5f   :  { %v415_v29 = vmul.f32 %v413_v0, %v407_v1  ;;  %v596_v0 = vld [vmem:[%s1064_s2 + $0xe8] sm:$0xff] }
 0xc60   :  { %631 = vmatpush.msra.mxu1 %v596_v0 }
 0xc61   :  { %417 = vrot.lane.b32.xlu0 %v415_v29, %s787_s25  ;;  %v595_v29 = vld [vmem:[%s1064_s2 + $0xe0] sm:$0xff] }
 0xc62   :  { %632 = vmatpush.msra.mxu1 %v595_v29 }
 0xcd3   :  { %v418_v30 = vpop.permute.xlu0 %417 }
 0xcd4   :  { %v420_v3 = vadd.f32 %v418_v30, %v410_v2  ;;  %v578_v2 = vld [vmem:[%s1064_s2 + $0x58] sm:$0xff] }
 0xcd5   :  { %v594_v30 = vld [vmem:[%s1064_s2 + $0xd8] sm:$0xff] }
 0xcd6   :  { %741 = vtanh.f32 %v420_v3  ;;  %633 = vmatpush.msra.mxu1 %v594_v30 }
 0xcdc   :  { %v742_v31 = vpop.eup %741 }
 0xcdd   :  { %423 = vrot.lane.b32.xlu1 %v742_v31, %s786_s24  ;;  %v593_v31 = vld [vmem:[%s1064_s2 + $0xd0] sm:$0xff] }
 0xcde   :  { %634 = vmatpush.msra.mxu1 %v593_v31 }
 0xd4f   :  { %v424_v32 = vpop.permute.xlu1 %423 }
 0xd50   :  { %v426_v33 = vmul.f32 %v424_v32, %v407_v1  ;;  %v579_v1 = vld [vmem:[%s1064_s2 + $0x60] sm:$0xff]  ;;  %v576_v32 = vld [vmem:[%s1064_s2 + $0x48] sm:$0xff] }
 0xd51   :  { %612 = vmatpush.msra.mxu0 %v579_v1 }
 0xd52   :  { %434 = vrot.lane.b32.xlu2 %v426_v33, %s787_s25 }
 0xd53   :  { %613 = vmatpush.msra.mxu0 %v578_v2 }
 0xdac   :  { %v435_v34 = vpop.permute.xlu2 %434 }
 0xdad   :  { %684 = vmatmul.msk.f32.vlgmr.msrb.gmra.mxu2 %vm23_vm5, %v435_v34 }
 0xe30   :  { %v455_v36 = vpop.f32.mrf.mxu2 }
 0xe31   :  { %v458_v37 = vadd.f32 %v683_v35, %v455_v36 }
 0xe33   :  { %743 = vtanh.f32 %v458_v37  ;;  %v685_v39 = vmul.f32 -1.442695, %v458_v37 }
 0xe35   :  { %745 = vpow2.f32 %v685_v39  ;;  %v591_v39 = vld [vmem:[%s1064_s2 + $0xc0] sm:$0xff] }
 0xe39   :  { %v744_v38 = vpop.eup %743 }
 0xe3a   :  { %481 = vrot.lane.b32.xlu0 %v744_v38, %s786_s24  ;;  %v575_v38 = vld [vmem:[%s1064_s2 + $0x40] sm:$0xff] }
 0xe3b   :  { %v746_v40 = vpop.eup %745 }
 0xe3c   :  { %v462_v41 = vadd.f32 1.0, %v746_v40  ;;  %v574_v40 = vld [vmem:[%s1064_s2 + $0x38] sm:$0xff] }
 0xe3e   :  { %747 = vrcp.f32 %v462_v41  ;;  %v474_v48 = vand.u32 2147483648, %v462_v41  ;;  %vm468_vm12 = vweird.f32 %v462_v41  ;;  %v472_v49 = vand.u32 2147483647, %v462_v41 }
 0xe40   :  { %v475_v51 = vor.u32 1.1754944e-38, %v474_v48  ;;  %vm473_vm14 = vcmp.eq.f32.partialorder %v472_v49, 8.507059e+37  ;;  %v587_v48 = vld [vmem:[%s1064_s2 + $0xa0] sm:$0xff]  ;;  %v570_v49 = vld [vmem:[%s1064_s2 + $0x18] sm:$0xff] }
 0xe44   :  { %v748_v42 = vpop.eup %747 }
 0xe45   :  { %v464_v44 = vmul.f32 %v748_v42, %v462_v41  ;;  %vm469_vm11 = vweird.f32 %v748_v42  ;;  %v590_v41 = vld [vmem:[%s1064_s2 + $0xb8] sm:$0xff] }
 0xe46   :  { %vm470_vm13 = vmor %vm468_vm12, %vm469_vm11 }
 0xe47   :  { %v465_v45 = vsub.f32 1.0, %v464_v44  ;;  %v589_v44 = vld [vmem:[%s1064_s2 + $0xb0] sm:$0xff] }
 0xe49   :  { %v466_v46 = vmul.f32 %v748_v42, %v465_v45  ;;  %v572_v45 = vld [vmem:[%s1064_s2 + $0x28] sm:$0xff] }
 0xe4b   :  { %v467_v47 = vadd.f32 %v748_v42, %v466_v46  ;;  %v588_v46 = vld [vmem:[%s1064_s2 + $0xa8] sm:$0xff] }
 0xe4d   :  { %v471_v50 = vsel %vm470_vm13, %v748_v42, %v467_v47  ;;  %v573_v42 = vld [vmem:[%s1064_s2 + $0x30] sm:$0xff]  ;;  %v571_v47 = vld [vmem:[%s1064_s2 + $0x20] sm:$0xff] }
 0xe4e   :  { %v476_v53 = vsel %vm473_vm14, %v475_v51, %v471_v50  ;;  %v586_v50 = vld [vmem:[%s1064_s2 + $0x98] sm:$0xff]  ;;  %v569_v51 = vld [vmem:[%s1064_s2 + $0x10] sm:$0xff] }
 0xe4f   :  { %v479_v56 = vmul.f32 %v476_v53, %v420_v3  ;;  %v577_v3 = vld [vmem:[%s1064_s2 + $0x50] sm:$0xff] }
 0xe50   :  { %614 = vmatpush.msra.mxu0 %v577_v3 }
 0xe52   :  { %615 = vmatpush.msra.mxu0 %v576_v32 }
 0xe54   :  { %616 = vmatpush.msra.mxu0 %v575_v38 }
 0xe56   :  { %617 = vmatpush.msra.mxu0 %v574_v40 }
 0xe58   :  { %618 = vmatpush.msra.mxu0 %v573_v42 }
 0xe5a   :  { %619 = vmatpush.msra.mxu0 %v572_v45 }
 0xe5c   :  { %620 = vmatpush.msra.mxu0 %v571_v47 }
 0xe5e   :  { %621 = vmatpush.msra.mxu0 %v570_v49 }
 0xe60   :  { %622 = vmatpush.msra.mxu0 %v569_v51 }
 0xeac   :  { %v482_v52 = vpop.permute.xlu0 %481 }
 0xead   :  { %v484_v54 = vmul.f32 %v482_v52, %v476_v53  ;;  %v585_v52 = vld [vmem:[%s1064_s2 + $0x90] sm:$0xff] }
 0xeaf   :  { %486 = vrot.lane.b32.xlu1 %v484_v54, %s787_s25  ;;  %v584_v54 = vld [vmem:[%s1064_s2 + $0x88] sm:$0xff] }
 0xf21   :  { %v487_v57 = vpop.permute.xlu1 %486 }
 0xf22   :  { %v931_v58 = vadd.f32 %v487_v57, %v479_v56  ;;  %v567_v56 = vld [vmem:[%s1064_s2] sm:$0xff] }
 0xf23   :  { %v583_v57 = vld [vmem:[%s1064_s2 + $0x80] sm:$0xff] }
 0xf24   :  { %749 = vtanh.f32 %v931_v58 }
 0xf2a   :  { %v750_v59 = vpop.eup %749 }
 0xf2b   :  { %492 = vrot.lane.b32.xlu2 %v750_v59, %s786_s24 }
 0xf85   :  { %v493_v60 = vpop.permute.xlu2 %492 }
 0xf86   :  { %v495_v61 = vmul.f32 %v493_v60, %v476_v53  ;;  %v568_v53 = vld [vmem:[%s1064_s2 + $0x8] sm:$0xff] }
 0xf87   :  { %623 = vmatpush.msra.mxu0 %v568_v53 }
 0xf88   :  { %503 = vrot.lane.b32.xlu0 %v495_v61, %s787_s25 }
 0xf89   :  { %624 = vmatpush.msra.mxu0 %v567_v56 }
 0xf90   :  { %154 = vrot.lane.b32.xlu0 %v874_v55, %s786_s24  ;;  %v686_v55 = vld [vmem:[%s1062_s0 + $0xe] sm:$0x3] }
 0xf98   :  { %224 = vrot.lane.b32.xlu0 %v889_v21, %s788_s12 }
 0xffa   :  { %v504_v62 = vpop.permute.xlu0 %503 }
 0xffb   :  { %687 = vmatmul.msk.f32.vlgmr.msrb.gmra.mxu3 %vm23_vm5, %v504_v62 }
0x1002   :  { %v155_v63 = vpop.permute.xlu0 %154 }
0x1003   :  { %158 = vst.msk [vmem:[#allocation2] sm:$0x3] %vm157_vm15, %v155_v63  ;;  %v694_v63 = vld [vmem:[%s1065_s3] ss:$0 sm:$0xff] }
0x100a   :  { %v225_v4 = vpop.permute.xlu0 %224 }
0x100b   :  { %228 = vst.msk [vmem:[#allocation2] sm:$0x3] %vm227_vm0, %v225_v4 }
0x100c   :  { %294 = vst.msk [vmem:[#allocation2] sm:$0x3] %vm293_vm1, %v904_v43 }
0x107e   :  { %v524_v21 = vpop.f32.mrf.mxu3 }
0x107f   :  { %v527_v5 = vadd.f32 %v686_v55, %v524_v21 }
0x1081   :  { %751 = vtanh.f32 %v527_v5  ;;  %v688_v7 = vmul.f32 -1.442695, %v527_v5 }
0x1083   :  { %753 = vpow2.f32 %v688_v7 }
0x1087   :  { %v752_v6 = vpop.eup %751 }
0x1088   :  { %550 = vrot.lane.b32.xlu1 %v752_v6, %s786_s24 }
0x1089   :  { %v754_v8 = vpop.eup %753 }
0x108a   :  { %v531_v9 = vadd.f32 1.0, %v754_v8 }
0x108c   :  { %755 = vrcp.f32 %v531_v9  ;;  %v543_v14 = vand.u32 2147483648, %v531_v9  ;;  %vm537_vm2 = vweird.f32 %v531_v9  ;;  %v541_v15 = vand.u32 2147483647, %v531_v9 }
0x108e   :  { %v544_v17 = vor.u32 1.1754944e-38, %v543_v14  ;;  %vm542_vm6 = vcmp.eq.f32.partialorder %v541_v15, 8.507059e+37 }
0x1090   :  { %428 = vrot.lane.b32.xlu1 %v426_v33, %s786_s24  ;;  %v592_v33 = vld [vmem:[%s1064_s2 + $0xc8] sm:$0xff]  ;;  %s789_s2 = smov [#allocation3]  }
0x1091   :  { %635 = vmatpush.msra.mxu1 %v592_v33  ;;  %s656_s23 = sshll.u32 %s789_s2, 4  ;;  %s657_s23 = int_to_ptr.vmem [resolvable:$true] %s656_s23 }
0x1092   :  { %v756_v10 = vpop.eup %755 }
0x1093   :  { %v533_v43 = vmul.f32 %v756_v10, %v531_v9  ;;  %vm538_vm5 = vweird.f32 %v756_v10  ;;  %636 = vmatpush.msra.mxu1 %v591_v39 }
0x1094   :  { %vm539_vm3 = vmor %vm537_vm2, %vm538_vm5 }
0x1095   :  { %v534_v11 = vsub.f32 1.0, %v533_v43  ;;  %637 = vmatpush.msra.mxu1 %v590_v41 }
0x1097   :  { %v535_v12 = vmul.f32 %v756_v10, %v534_v11  ;;  %638 = vmatpush.msra.mxu1 %v589_v44 }
0x1098   :  { %497 = vrot.lane.b32.xlu1 %v495_v61, %s788_s12 }
0x1099   :  { %v536_v13 = vadd.f32 %v756_v10, %v535_v12  ;;  %639 = vmatpush.msra.mxu1 %v588_v46 }
0x109b   :  { %v540_v16 = vsel %vm539_vm3, %v756_v10, %v536_v13  ;;  %640 = vmatpush.msra.mxu1 %v587_v48 }
0x109c   :  { %v949_v19 = vsel %vm542_vm6, %v544_v17, %v540_v16 }
0x109d   :  { %v548_v34 = vmul.f32 %v949_v19, %v931_v58  ;;  %641 = vmatpush.msra.mxu1 %v586_v50 }
0x109f   :  { %642 = vmatpush.msra.mxu1 %v585_v52 }
0x10a1   :  { %643 = vmatpush.msra.mxu1 %v584_v54 }
0x10a3   :  { %644 = vmatpush.msra.mxu1 %v583_v57 }
0x10fa   :  { %v551_v18 = vpop.permute.xlu1 %550 }
0x10fb   :  { %v553_v20 = vmul.f32 %v551_v18, %v949_v19 }
0x10fd   :  { %555 = vrot.lane.b32.xlu2 %v553_v20, %s787_s25 }
0x1102   :  { %v429_v22 = vpop.permute.xlu1 %428 }
0x1103   :  { %431 = vst.msk [vmem:[#allocation2 + $0x2] sm:$0x3] %vm157_vm15, %v429_v22 }
0x110a   :  { %v498_v23 = vpop.permute.xlu1 %497 }
0x110b   :  { %500 = vst.msk [vmem:[#allocation2 + $0x2] sm:$0x3] %vm227_vm0, %v498_v23 }
0x1157   :  { %v556_v35 = vpop.permute.xlu2 %555 }
0x1158   :  { %v558_v36 = vadd.f32 %v556_v35, %v548_v34 }
0x115a   :  { %757 = vtanh.f32 %v558_v36 }
0x1160   :  { %v758_v37 = vpop.eup %757 }
0x1161   :  { %561 = vrot.lane.b32.xlu2 %v758_v37, %s786_s24 }
0x11bb   :  { %v562_v58 = vpop.permute.xlu2 %561 }
0x11bc   :  { %v564_v59 = vmul.f32 %v562_v58, %v949_v19 }
0x11be   :  { %565 = vst.msk [vmem:[#allocation2 + $0x2] sm:$0x3] %vm293_vm1, %v564_v59 }
0x11c5   :  { %v566_v60 = vld [vmem:[#allocation2] sm:$0xf] }
0x11c6   :  { %604 = vst [vmem:[#allocation1] ss:$4 sm:$0xff] %v566_v60 }
0x11cd   :  { %v605_v61 = vld.sshfl [vmem:[#allocation1] sm:$0xff pattern:$0x73625140]  ;;  %v606_v62 = vld.sshfl [vmem:[#allocation1 + $0x8] sm:$0xff pattern:$0x73625140] }
0x11ce   :  { %625 = vmatmul.f32.vlgmr.msra.gmra.mxu0 %v605_v61  ;;  %645 = vmatmul.f32.vlgmr.msra.gmra.mxu1 %v606_v62 }
0x124b   :  { %v626_v4 = vpop.f32.mrf.mxu0  ;;  %v646_v21 = vpop.f32.mrf.mxu1 }
0x124c   :  { %v627_v55 = vadd.f32 %v694_v63, %v626_v4 }
0x124e   :  { %v647_v5 = vadd.f32 %v646_v21, %v627_v55 }
0x1250   :  { %650 = vst.msk [vmem:[#allocation3] sm:$0x3] %vm649_vm7, %v647_v5 }
0x1251   :  { %661 = dma.vmem_to_hbm [thread:$0]  %s657_s23, 32, %s659_s27, [#allocation4]  }
0x1252   :  { %783 = dma.done.wait [#allocation4], 32  }
0x1253   :  { %784 = vsyncadd [#allocation4], 4294967264 }
0x1254   :  { %666 = vsyncpa [#allocation4], 1 }

</bundles_post_ra>
